<compile_context>
chip_gen: v6e
topology: v6e:2x2x1
jax: 0.10.0
libtpu: 0.0.40
codegen_flags: <defaults>
</compile_context>

<pallas_src>
import functools

import jax
import jax.numpy as jnp
from jax import lax
from jax.experimental import pallas as pl
from jax.experimental.pallas import tpu as pltpu


def _round_up(x, m):
    return (x + m - 1) // m * m


def _categorical_kernel(x_ref, w_ref, b_ref, logp_ref, mode_ref, *, dout):
    x = x_ref[...]                       # [TB, Din]   (f32 or bf16)
    w = w_ref[...]                       # [Dout, Din] resident
    b = b_ref[...].astype(jnp.float32)   # [1, Dout]   resident

    # Linear layer on the MXU with transposed-RHS contraction, f32 accumulation.
    logits = lax.dot_general(
        x, w,
        dimension_numbers=(((1,), (1,)), ((), ())),
        preferred_element_type=jnp.float32,
    ) + b                                # [TB, Dout] f32

    # Numerically-stable log-softmax over the last axis (f32 throughout).
    m = jnp.max(logits, axis=-1, keepdims=True)
    z = logits - m
    s = jnp.sum(jnp.exp(z), axis=-1, keepdims=True)
    logp_ref[...] = (z - jnp.log(s)).astype(logp_ref.dtype)

    # Fused mode(): first-occurrence argmax over the Dout lanes; avoids a
    # second [B, Dout] HBM round trip for the downstream argmax.
    col = lax.broadcasted_iota(jnp.int32, logits.shape, 1)
    idx = jnp.where(logits >= m, col, jnp.int32(dout))
    mode = jnp.min(idx, axis=-1, keepdims=True)
    # Clamp guards the all-NaN-row edge case (otherwise index == dout).
    mode_ref[...] = jnp.minimum(mode, dout - 1).astype(jnp.int32)


def _vmem_capacity_bytes():
    """Physical VMEM per TensorCore; conservative fallback = v7x (64 MiB)."""
    try:
        return int(pltpu.get_tpu_info().vmem_capacity_bytes)
    except Exception:
        return 64 << 20


def _pick_tile_rows(b, per_row_bytes, tb_max, tile_budget_bytes):
    """Largest balanced batch tile (multiple of 8) fitting the VMEM budget."""
    tb_fit = max(8, (tile_budget_bytes // per_row_bytes) // 8 * 8)
    tb_cap = max(8, min(tb_max, tb_fit))
    n_tiles = pl.cdiv(b, tb_cap)
    return _round_up(pl.cdiv(b, n_tiles), 8)


def categorical_forward(x, weight, bias, *, tb_max=8192):
    """x: [B, Din] (f32 or bf16), weight: [Dout, Din] (nn.Linear layout),
    bias: [Dout].

    Returns (log_probs, mode):
        log_probs [B, Dout] f32   log_softmax(x @ W.T + b)  (torch's .logits)
        mode      [B, 1]    int32 argmax over the last axis
    """
    B, Din = x.shape
    Dout, Din_w = weight.shape
    assert Din == Din_w, (Din, Din_w)

    x_bytes = jnp.dtype(x.dtype).itemsize
    w_bytes = jnp.dtype(weight.dtype).itemsize

    cap = _vmem_capacity_bytes()
    # Weight/bias blocks are resident (index_map always (0,0)) but BlockSpec
    # still allocates 2 pipeline buffers each — count them.
    resident_bytes = 2 * (Dout * Din * w_bytes + Dout * 4)
    # Keep streamed tiles + resident params within ~half of physical VMEM so
    # the scoped limit we request always has headroom (v5e/v6e/v7x).
    tile_budget = max((cap // 2) - resident_bytes, 1 << 20)
    # Double-buffered per-row bytes: x tile + log_probs out + mode out.
    per_row_bytes = 2 * (Din * x_bytes + Dout * 4 + 4)

    TB = _pick_tile_rows(B, per_row_bytes, tb_max, tile_budget)
    Bp = _round_up(B, TB)
    if Bp != B:
        x = jnp.pad(x, ((0, Bp - B), (0, 0)))

    b2 = bias.reshape(1, Dout).astype(jnp.float32)
    grid = (Bp // TB,)
    vmem_limit = int(min(cap, resident_bytes + TB * per_row_bytes + (8 << 20)))

    log_probs, mode = pl.pallas_call(
        functools.partial(_categorical_kernel, dout=Dout),
        out_shape=(
            jax.ShapeDtypeStruct((Bp, Dout), jnp.float32),
            jax.ShapeDtypeStruct((Bp, 1), jnp.int32),
        ),
        grid=grid,
        in_specs=[
            pl.BlockSpec((TB, Din), lambda i: (i, 0)),     # batch-tiled x
            pl.BlockSpec((Dout, Din), lambda i: (0, 0)),   # resident weight
            pl.BlockSpec((1, Dout), lambda i: (0, 0)),     # resident bias
        ],
        out_specs=(
            pl.BlockSpec((TB, Dout), lambda i: (i, 0)),    # log_probs
            pl.BlockSpec((TB, 1), lambda i: (i, 0)),       # mode
        ),
        compiler_params=pltpu.CompilerParams(
            dimension_semantics=("parallel",),             # megacore sharding
            vmem_limit_bytes=vmem_limit),
    )(x, weight, b2)

    if Bp != B:
        log_probs = log_probs[:B]
        mode = mode[:B]
    return log_probs, mode


class FixedCategoricalJax:
    """Mirror of FixedCategorical built from the kernel outputs.

    `.logits` is the *normalized* (log_softmax) logits, matching
    torch.distributions.Categorical(logits=x).logits.
    """

    def __init__(self, log_probs, mode):
        self.logits = log_probs            # normalized, torch-compatible
        self._mode = mode                  # fused in-kernel argmax, [B, 1] i32
        self._probs = None

    @property
    def probs(self):
        if self._probs is None:
            self._probs = jnp.exp(self.logits)   # lazy; not written by kernel
        return self._probs

    def mode(self):
        return self._mode

    def log_probs(self, actions):
        # actions: [B, 1] int -> gather normalized log-prob, keep [B, 1]
        a = actions.reshape(actions.shape[0], -1)[:, :1]
        lp = jnp.take_along_axis(self.logits, a, axis=-1)
        return lp.reshape(actions.shape[0], -1).sum(-1, keepdims=True)

    def entropy(self):
        # Clamp like torch to avoid 0 * -inf NaNs on degenerate rows.
        lg = jnp.clip(self.logits, jnp.finfo(self.logits.dtype).min, None)
        return -jnp.sum(self.probs * lg, axis=-1)

    # TODO(synk): sampling needs RNG; done with jax.random outside the kernel
    # (jax.random.categorical is shift-invariant, normalized logits are fine).
    def sample(self, key):
        return jax.random.categorical(key, self.logits, axis=-1)[..., None]


def orthogonal_init(key, rows, cols, gain):
    """Deterministic orthogonal init (QR-based, nn.init.orthogonal_ semantics)."""
    a = jax.random.normal(key, (max(rows, cols), min(rows, cols)), dtype=jnp.float32)
    q, r = jnp.linalg.qr(a)
    d = jnp.diag(r)
    q = q * jnp.where(d == 0, 1.0, jnp.sign(d))   # sign fix, 0-safe
    if rows < cols:
        q = q.T
    return gain * q[:rows, :cols]


def _reference(x, weight, bias):
    logits = x.astype(jnp.float32) @ weight.astype(jnp.float32).T + bias
    logp = jax.nn.log_softmax(logits, axis=-1)
    mode = jnp.argmax(logits, axis=-1, keepdims=True).astype(jnp.int32)
    return logp, mode


if __name__ == "__main__":
    num_inputs = 32
    num_outputs = 16

    key = jax.random.PRNGKey(0)
    k_w, k_x1, k_x2 = jax.random.split(key, 3)

    # Module __init__: orthogonal weight with gain=0.01, zero bias.
    weight = orthogonal_init(k_w, num_outputs, num_inputs, gain=0.01)  # [Dout, Din]
    bias = jnp.zeros((num_outputs,), dtype=jnp.float32)

    # --- small aligned batch ---
    x = jax.random.normal(k_x1, (8, num_inputs), dtype=jnp.float32)
    log_probs, mode = categorical_forward(x, weight, bias)
    jax.block_until_ready((log_probs, mode))

    ref_logp, ref_mode = _reference(x, weight, bias)
    assert jnp.allclose(log_probs, ref_logp, atol=1e-5)
    assert jnp.array_equal(mode, ref_mode)

    dist = FixedCategoricalJax(log_probs, mode)
    assert jnp.allclose(dist.probs, jnp.exp(ref_logp), atol=1e-5)
    lp = dist.log_probs(dist.mode())
    ref_lp = jnp.take_along_axis(ref_logp, ref_mode, axis=-1)
    assert jnp.allclose(lp, ref_lp, atol=1e-5)
    ent = dist.entropy()
    ref_ent = -jnp.sum(jnp.exp(ref_logp) * ref_logp, axis=-1)
    assert jnp.allclose(ent, ref_ent, atol=1e-5)

    # --- non-multiple-of-8 batch: exercises balanced tiling + small padding ---
    x2 = jax.random.normal(k_x2, (300, num_inputs), dtype=jnp.float32)
    log_probs2, mode2 = categorical_forward(x2, weight, bias)
    jax.block_until_ready((log_probs2, mode2))
    ref_logp2, ref_mode2 = _reference(x2, weight, bias)
    assert log_probs2.shape == (300, num_outputs)
    assert jnp.allclose(log_probs2, ref_logp2, atol=1e-5)
    assert jnp.array_equal(mode2, ref_mode2)

    # NOTE: at these batch sizes this head is below the TPU architecture
    # floor; the kernel pays off once B is in the thousands (the balanced
    # tiling and VMEM-aware tile sizing above handle that case).
    print("KERNEL_OK")
</pallas_src>

<mosaic_0001>
module attributes {stable_mosaic.version = 11 : i64} {
  func.func @_categorical_kernel(%arg0: i32, %arg1: memref<8x32xf32, #tpu.memory_space<vmem>>, %arg2: memref<16x32xf32, #tpu.memory_space<vmem>>, %arg3: memref<1x16xf32, #tpu.memory_space<vmem>>, %arg4: memref<8x16xf32, #tpu.memory_space<vmem>>, %arg5: memref<8x1xi32, #tpu.memory_space<vmem>>) attributes {dimension_semantics = [#tpu.dimension_semantics<parallel>], iteration_bounds = array<i64: 1>, scalar_prefetch = 0 : i64, scratch_operands = 0 : i64, tpu.core_type = #tpu.core_type<tc>, window_params = [{transform_indices = @transform_0, window_bounds = array<i64: 8, 32>}, {pipeline_mode = #tpu.pipeline_mode<synchronous>, transform_indices = @transform_1, window_bounds = array<i64: 16, 32>}, {pipeline_mode = #tpu.pipeline_mode<synchronous>, transform_indices = @transform_2, window_bounds = array<i64: 1, 16>}, {transform_indices = @transform_3, window_bounds = array<i64: 8, 16>}, {transform_indices = @transform_4, window_bounds = array<i64: 8, 1>}]} {
    %c0 = arith.constant 0 : index
    %c0_0 = arith.constant 0 : index
    %0 = vector.load %arg1[%c0, %c0_0] : memref<8x32xf32, #tpu.memory_space<vmem>>, vector<8x32xf32>
    %c0_1 = arith.constant 0 : index
    %c0_2 = arith.constant 0 : index
    %1 = vector.load %arg2[%c0_1, %c0_2] : memref<16x32xf32, #tpu.memory_space<vmem>>, vector<16x32xf32>
    %c0_3 = arith.constant 0 : index
    %c0_4 = arith.constant 0 : index
    %2 = vector.load %arg3[%c0_3, %c0_4] : memref<1x16xf32, #tpu.memory_space<vmem>>, vector<1x16xf32>
    %cst = arith.constant dense<0.000000e+00> : vector<8x16xf32>
    %3 = tpu.matmul %0, %1, %cst {dimension_numbers = #tpu.dot_dimension_numbers<[1], [1], [0], [0], [0, 0, 1, 0], [], []>} : vector<8x32xf32>, vector<16x32xf32>, vector<8x16xf32> -> vector<8x16xf32>
    %4 = vector.broadcast %2 : vector<1x16xf32> to vector<8x16xf32>
    %5 = arith.addf %3, %4 : vector<8x16xf32>
    %cst_5 = arith.constant dense<0xFF800000> : vector<8xf32>
    %6 = vector.multi_reduction <maximumf>, %5, %cst_5 [1] : vector<8x16xf32> to vector<8xf32>
    %7 = vector.shape_cast %6 : vector<8xf32> to vector<8x1xf32>
    %8 = vector.broadcast %7 : vector<8x1xf32> to vector<8x16xf32>
    %9 = arith.subf %5, %8 : vector<8x16xf32>
    %10 = math.exp %9 : vector<8x16xf32>
    %cst_6 = arith.constant dense<0.000000e+00> : vector<8xf32>
    %11 = vector.multi_reduction <add>, %10, %cst_6 [1] : vector<8x16xf32> to vector<8xf32>
    %12 = vector.shape_cast %11 : vector<8xf32> to vector<8x1xf32>
    %13 = math.log %12 : vector<8x1xf32>
    %14 = vector.broadcast %13 : vector<8x1xf32> to vector<8x16xf32>
    %15 = arith.subf %9, %14 : vector<8x16xf32>
    %c0_7 = arith.constant 0 : index
    %c0_8 = arith.constant 0 : index
    %16 = vector.load %arg4[%c0_7, %c0_8] : memref<8x16xf32, #tpu.memory_space<vmem>>, vector<8x16xf32>
    tpu.vector_store %arg4[%c0_7, %c0_8], %15 {strides = array<i32>} : memref<8x16xf32, #tpu.memory_space<vmem>>, vector<8x16xf32>,
    %17 = tpu.iota {dimensions = array<i32: 1>} : vector<8x16xi32>
    %18 = vector.broadcast %7 : vector<8x1xf32> to vector<8x16xf32>
    %19 = arith.cmpf oge, %5, %18 : vector<8x16xf32>
    %c16_i32 = arith.constant 16 : i32
    %20 = vector.broadcast %c16_i32 : i32 to vector<8x16xi32>
    %21 = arith.select %19, %17, %20 : vector<8x16xi1>, vector<8x16xi32>
    %cst_9 = arith.constant dense<2147483647> : vector<8xi32>
    %22 = vector.multi_reduction <minsi>, %21, %cst_9 [1] : vector<8x16xi32> to vector<8xi32>
    %23 = vector.shape_cast %22 : vector<8xi32> to vector<8x1xi32>
    %c15_i32 = arith.constant 15 : i32
    %24 = vector.broadcast %c15_i32 : i32 to vector<8x1xi32>
    %25 = arith.minsi %23, %24 : vector<8x1xi32>
    %c0_10 = arith.constant 0 : index
    %c0_11 = arith.constant 0 : index
    %26 = vector.load %arg5[%c0_10, %c0_11] : memref<8x1xi32, #tpu.memory_space<vmem>>, vector<8x1xi32>
    tpu.vector_store %arg5[%c0_10, %c0_11], %25 {strides = array<i32>} : memref<8x1xi32, #tpu.memory_space<vmem>>, vector<8x1xi32>,
    return
  }
  func.func @transform_0(%arg0: i32) -> (i32, i32) {
    %c0_i32 = arith.constant 0 : i32
    %c0_i32_0 = arith.constant 0 : i32
    return %arg0, %c0_i32 : i32, i32
  }
  func.func @transform_1(%arg0: i32) -> (i32, i32) {
    %c0_i32 = arith.constant 0 : i32
    %c0_i32_0 = arith.constant 0 : i32
    %c0_i32_1 = arith.constant 0 : i32
    return %c0_i32, %c0_i32_0 : i32, i32
  }
  func.func @transform_2(%arg0: i32) -> (i32, i32) {
    %c0_i32 = arith.constant 0 : i32
    %c0_i32_0 = arith.constant 0 : i32
    %c0_i32_1 = arith.constant 0 : i32
    return %c0_i32, %c0_i32_0 : i32, i32
  }
  func.func @transform_3(%arg0: i32) -> (i32, i32) {
    %c0_i32 = arith.constant 0 : i32
    %c0_i32_0 = arith.constant 0 : i32
    return %arg0, %c0_i32 : i32, i32
  }
  func.func @transform_4(%arg0: i32) -> (i32, i32) {
    %c0_i32 = arith.constant 0 : i32
    %c0_i32_0 = arith.constant 0 : i32
    return %arg0, %c0_i32 : i32, i32
  }
}

</mosaic_0001>

<bundles_post_ra>
// kernel: tpu_custom_call.1
= control target key start
LH: loop header
LB: loop body
LE: loop exit
PB: predicated region body
PF: predicated region fallthrough
CT: control target
= control target key end

     0   :  { %10 = vsyncpa [#allocation3], 0  ;;  %s332_s0 = inlined_call_operand.hbm [shape: f32[8,32], index: 0, kind: input, shape index: {}]   ;;  %s333_s1 = inlined_call_operand.hbm [shape: f32[16,32], index: 1, kind: input, shape index: {}]   ;;  %s334_s2 = inlined_call_operand.vmem [shape: f32[1,16], index: 2, kind: input, shape index: {}]   ;;  %s335_s3 = inlined_call_operand.hbm [shape: f32[8,16], index: 3, kind: output, shape index: {0}]   ;;  %s336_s4 = inlined_call_operand.vmem [shape: s32[8,1], index: 4, kind: output, shape index: {1}]  }
   0x1   :  { %11 = vsyncpa [#allocation6], 0 }
   0x2   :  { %12 = vsyncpa [#allocation4], 0  ;;  %s281_s15 = smov [#allocation2]   ;;  %s282_s17 = smov [#allocation5]  }
   0x3   :  { %s19_s16 = sshll.u32 %s281_s15, 4  ;;  %s28_s18 = sshll.u32 %s282_s17, 4  ;;  %s20_s16 = int_to_ptr.vmem [resolvable:$true] %s19_s16  ;;  %s29_s18 = int_to_ptr.vmem [resolvable:$true] %s28_s18 }
   0x4   :  { %s223_s19 = scalar_lea.vmem %s20_s16, 128  ;;  %p228_p1 = scmp.lt.s32.totalorder %s20_s16, %s20_s16 }
   0x5   :  { %p224_p0 = scmp.ne.s32.totalorder %s20_s16, %s223_s19  ;;  %p229_p2 = scmp.lt.s32.totalorder %s223_s19, %s223_s19 }
   0x7   :  { %p230_p3 = por %p229_p2, %p228_p1 }
   0x9   :  { %p231_p4 = pnand %p230_p3, %p224_p0 }
   0xb   :  { %234 = shalt.err (!%p231_p4)
}
   0xc   :  { %22 = dma.hbm_to_vmem [thread:$0]  %s332_s0, 128, %s20_s16, [#allocation3]  }
   0xd   :  { %s243_s22 = scalar_lea.vmem %s29_s18, 256  ;;  %p248_p6 = scmp.lt.s32.totalorder %s29_s18, %s29_s18 }
   0xe   :  { %p244_p5 = scmp.ne.s32.totalorder %s29_s18, %s243_s22  ;;  %p249_p7 = scmp.lt.s32.totalorder %s243_s22, %s243_s22 }
  0x10   :  { %p250_p8 = por %p249_p7, %p248_p6 }
  0x12   :  { %p251_p9 = pnand %p250_p8, %p244_p5 }
  0x14   :  { %254 = shalt.err (!%p251_p9)
}
  0x15   :  { %s283_s23 = smov 128   ;;  %s284_s24 = smov 8  }
  0x16   :  { %34 = dma.hbm_to_vmem [thread:$0]  %s333_s1, 256, %s29_s18, [#allocation6], %s283_s23, %s283_s23, %s284_s24  }
  0x17   :  { %275 = dma.done.wait [#allocation3], 128  }
  0x18   :  { %276 = vsyncadd [#allocation3], 4294967168 }
  0x19   :  { %277 = dma.done.wait [#allocation6], 256  }
  0x1a   :  { %278 = vsyncadd [#allocation6], 4294967040  ;;  %v285_v0 = vmov 0.0   ;;  %vm286_vm0 = vmmov 0   ;;  %vm53_vm1 = vcmask 261120   ;;  %v45_v1 = vld [vmem:[#allocation5 + $0x8] sm:$0xff]  ;;  %v147_v9 = vlaneseq }
  0x1b   :  { %197 = vmatprep.subr.mxu0 %v285_v0  ;;  %201 = vmatprep.mubr.msk.f32.mxu0 %vm286_vm0, %v285_v0  ;;  %v44_v2 = vld [vmem:[#allocation5] sm:$0xff]  ;;  %v43_v3 = vld [vmem:[#allocation2] sm:$0xff]  ;;  %vm133_vm2 = vcmask 130048   ;;  %s287_s1 = smov [#allocation7]  }
  0x1c   :  { %198 = vmatpush3.xpose.msk.msra.mxu0 %vm53_vm1, %v45_v1  ;;  %v190_v4 = vld [vmem:[%s334_s2] ss:$0 sm:$0xff]  ;;  %v148_v10 = vand.u32 127, %v147_v9  ;;  %s176_s2 = sshll.u32 %s287_s1, 4  ;;  %s177_s2 = int_to_ptr.vmem [resolvable:$true] %s176_s2 }
  0x1d   :  { %199 = vmatprep.subr.mxu0 %v285_v0  ;;  %s255_s28 = scalar_lea.vmem %s177_s2, 128  ;;  %p260_p11 = scmp.lt.s32.totalorder %s177_s2, %s177_s2 }
  0x1e   :  { %p256_p10 = scmp.ne.s32.totalorder %s177_s2, %s255_s28  ;;  %p261_p12 = scmp.lt.s32.totalorder %s255_s28, %s255_s28 }
  0x20   :  { %200 = vmatpush3.xpose.msk.msra.mxu0 %vm53_vm1, %v44_v2  ;;  %p262_p13 = por %p261_p12, %p260_p11 }
  0x22   :  { %p263_p0 = pnand %p262_p13, %p256_p10 }
  0x23   :  { %202 = vmatmul.mubr.msk.f32.vlgmr.msra.gmra.mxu0 %vm53_vm1, %v43_v3 }
  0xe3   :  { %v129_v5 = vpop.f32.mrf.mxu0 }
  0xe4   :  { %v130_v6 = vadd.f32 %v190_v4, %v129_v5 }
  0xe5   :  { %v203_v7 = vpop.f32.mrf.mxu0 }
  0xe6   :  { %v134_v8 = vsel %vm133_vm2, %v130_v6, -inf }
  0xe7   :  { %135 = vmax.xlane.f32.xlu0 %v134_v8 }
 0x170   :  { %v136_v11 = vpop.xlane.xlu0 %135 }
 0x171   :  { %v137_v12 = vsub.f32 %v130_v6, %v136_v11  ;;  %vm149_vm3 = vcmp.ge.f32.partialorder %v130_v6, %v136_v11 }
 0x172   :  { %v150_v13 = vsel %vm149_vm3, %v148_v10, 16 }
 0x173   :  { %v138_v14 = vmul.f32 1.442695, %v137_v12  ;;  %v151_v15 = vsel %vm133_vm2, %v150_v13, 2147483647 }
 0x174   :  { %v153_v16 = vshra.s32 %v151_v15, 16  ;;  %v152_v20 = vand.u32 65535, %v151_v15 }
 0x175   :  { %211 = vpow2.f32 %v138_v14 }
 0x176   :  { %v155_v17 = vcvt.s32.f32 %v153_v16  ;;  %v154_v22 = vcvt.s32.f32 %v152_v20 }
 0x178   :  { %156 = vmin.xlane.f32.xlu0 %v155_v17 }
 0x182   :  { %v212_v18 = vpop.eup %211 }
 0x183   :  { %v140_v19 = vsel %vm133_vm2, %v212_v18, 0.0 }
 0x184   :  { %141 = vadd.xlane.f32.xlu1 %v140_v19 }
 0x201   :  { %v157_v21 = vpop.xlane.xlu0 %156 }
 0x202   :  { %vm158_vm4 = vcmp.eq.f32.partialorder %v155_v17, %v157_v21 }
 0x203   :  { %v159_v23 = vsel %vm158_vm4, %v154_v22, inf }
 0x204   :  { %160 = vmin.xlane.f32.xlu1 %v159_v23 }
 0x20d   :  { %v142_v24 = vpop.xlane.xlu1 %141 }
 0x20e   :  { %213 = vlog2.f32 %v142_v24 }
 0x21b   :  { %v214_v25 = vpop.eup %213 }
 0x21c   :  { %v144_v26 = vmul.f32 0.6931472, %v214_v25 }
 0x21e   :  { %v145_v27 = vsub.f32 %v137_v12, %v144_v26 }
 0x220   :  { %146 = vst.msk [vmem:[#allocation7] sm:$0xff] %vm133_vm2, %v145_v27 }
 0x221   :  { %266 = shalt.err (!%p263_p0)
}
 0x222   :  { %179 = dma.vmem_to_hbm [thread:$0]  %s177_s2, 128, %s335_s3, [#allocation4]   ;;  %v163_v28 = vcvt.f32.s32 %v157_v21  ;;  %vm168_vm5 = vcmask 7168  }
 0x224   :  { %v164_v30 = vshll.u32 %v163_v28, 16 }
 0x28d   :  { %v161_v29 = vpop.xlane.xlu1 %160 }
 0x28e   :  { %v162_v31 = vcvt.f32.s32 %v161_v29 }
 0x290   :  { %v165_v32 = vadd.s32 %v164_v30, %v162_v31 }
 0x292   :  { %vm166_vm6 = vcmp.lt.s32.totalorder %v165_v32, 15 }
 0x293   :  { %v167_v33 = vsel %vm166_vm6, %v165_v32, 15 }
 0x294   :  { %169 = vst.msk [vmem:[%s336_s4] sm:$0xff] %vm168_vm5, %v167_v33 }
 0x295   :  { %279 = dma.done.wait [#allocation4], 128  }
 0x296   :  { %280 = vsyncadd [#allocation4], 4294967168 }
 0x297   :  { %187 = vsyncpa [#allocation3], 1 }
 0x298   :  { %188 = vsyncpa [#allocation6], 1 }
 0x299   :  { %189 = vsyncpa [#allocation4], 1 }

</bundles_post_ra>
